<compile_context>
chip_gen: v7x
topology: tpu7x:2x2x1
jax: 0.10.0
libtpu: 0.0.40
codegen_flags: <defaults>
</compile_context>

<pallas_src>
import math

import jax
import jax.numpy as jnp
from jax.experimental import pallas as pl
from jax.experimental.pallas import tpu as pltpu


def _make_cheb_kernel(mxu_dtype):
    """Kernel factory; `mxu_dtype` is the dtype fed to the MXU (f32 or bf16)."""

    def kernel(gso_ref, x_ref, w_ref, b_ref, out_ref, tbuf):
        k = pl.program_id(0)
        last = pl.num_programs(0) - 1
        cur = k & 1          # ping-pong slot that will hold T_k
        prev = 1 - cur       # slot holding T_{k-1}

        # ---- step 0: T_0 = x, zero the resident output accumulator --------
        @pl.when(k == 0)
        def _():
            tbuf[0] = x_ref[...]
            out_ref[...] = jnp.zeros_like(out_ref)

        # ---- step 1: T_1 = gso @ T_0 ---------------------------------------
        @pl.when(k == 1)
        def _():
            tbuf[1] = jnp.dot(
                gso_ref[...].astype(mxu_dtype),
                tbuf[0].astype(mxu_dtype),
                preferred_element_type=jnp.float32)

        # ---- step k>=2: T_k = 2 * gso @ T_{k-1} - T_{k-2} -------------------
        # T_{k-2} is in slot `cur`, exactly the slot T_k replaces, so it is
        # read (inside the expression) before being overwritten: no copy.
        @pl.when(k >= 2)
        def _():
            t_new = 2.0 * jnp.dot(
                gso_ref[...].astype(mxu_dtype),
                tbuf[prev].astype(mxu_dtype),
                preferred_element_type=jnp.float32) - tbuf[cur]
            tbuf[cur] = t_new

        # ---- accumulate T_k @ W_k directly into the resident output tile ---
        out_ref[...] += jnp.dot(
            tbuf[cur].astype(mxu_dtype),
            w_ref[...].astype(mxu_dtype),
            preferred_element_type=jnp.float32)

        # ---- finalize: add bias on the last step ----------------------------
        @pl.when(k == last)
        def _():
            out_ref[...] += b_ref[...]

    return kernel


def _build_call(K, N, f_in, f_out_p, mxu_dtype, single_buffer_inputs):
    """Construct the pallas_call for the given (padded) problem size."""
    pm = pl.Buffered(1) if single_buffer_inputs else None

    # Advisory cost estimate for XLA's scheduler.
    flops = K * 2 * N * f_in * f_out_p + max(K - 1, 0) * 2 * N * N * f_in
    bytes_accessed = 4 * (N * N + N * f_in + K * f_in * f_out_p
                          + f_out_p + N * f_out_p)

    # VMEM actually needed: gso + x (single-buffered), double-buffered W_k
    # and bias tiles, the resident output tile and the ping-pong T scratch.
    vmem_need = 4 * (N * N + N * f_in
                     + 2 * f_in * f_out_p
                     + 2 * f_out_p
                     + N * f_out_p
                     + 2 * N * f_in)
    vmem_limit = int(min(max(2 * vmem_need + (8 << 20), 32 << 20), 128 << 20))

    return pl.pallas_call(
        _make_cheb_kernel(mxu_dtype),
        out_shape=jax.ShapeDtypeStruct((N, f_out_p), jnp.float32),
        grid_spec=pltpu.PrefetchScalarGridSpec(
            num_scalar_prefetch=0,
            grid=(K,),
            in_specs=[
                # gso / x: constant index_map -> single-buffer them.
                pl.BlockSpec((N, N), lambda k: (0, 0), pipeline_mode=pm),
                pl.BlockSpec((N, f_in), lambda k: (0, 0), pipeline_mode=pm),
                # W_k: leading K dim squeezed so the kernel sees (F_in, F_out).
                pl.BlockSpec((pl.Squeezed(), f_in, f_out_p),
                             lambda k: (k, 0, 0)),
                pl.BlockSpec((1, f_out_p), lambda k: (0, 0)),
            ],
            out_specs=pl.BlockSpec((N, f_out_p), lambda k: (0, 0)),
            scratch_shapes=[
                pltpu.VMEM((2, N, f_in), jnp.float32),   # ping-pong T buffers
            ],
        ),
        compiler_params=pltpu.CompilerParams(
            dimension_semantics=("arbitrary",),   # K carries the recurrence
            vmem_limit_bytes=vmem_limit),
        cost_estimate=pl.CostEstimate(
            flops=flops, transcendentals=0, bytes_accessed=bytes_accessed),
    )


def cheb_graph_conv(x, gso, weight, bias, *, mxu_dtype=jnp.float32):
    """x: (N, F_in), gso: (N, N), weight: (K, F_in, F_out), bias: (F_out,).

    `mxu_dtype=jnp.bfloat16` feeds the MXU bf16 inputs (v6e/v7x throughput);
    the carried recurrence state and the accumulator always stay float32.
    """
    K, f_in, f_out = weight.shape
    N = x.shape[0]

    x = x.astype(jnp.float32)
    gso = gso.astype(jnp.float32)
    weight = weight.astype(jnp.float32)
    bias = bias.astype(jnp.float32)

    # Lane-dense output: pad F_out up to a multiple of 128 so output stores
    # are full-width vst (not masked vst.msk); slice the padding off after.
    f_out_p = ((f_out + 127) // 128) * 128
    if f_out_p != f_out:
        weight = jnp.pad(weight, ((0, 0), (0, 0), (0, f_out_p - f_out)))
        bias = jnp.pad(bias, (0, f_out_p - f_out))
    bias2d = bias.reshape(1, f_out_p)

    args = (gso, x, weight, bias2d)
    try:
        out = _build_call(K, N, f_in, f_out_p, mxu_dtype,
                          single_buffer_inputs=True)(*args)
    except Exception:
        # pipeline_mode=pl.Buffered(1) unsupported on this jax build; fall
        # back to default double-buffered pipelining (correctness identical).
        out = _build_call(K, N, f_in, f_out_p, mxu_dtype,
                          single_buffer_inputs=False)(*args)

    return out[:, :f_out] if f_out_p != f_out else out


def _reference(x, gso, weight, bias):
    """Pure-JAX reference mirroring the PyTorch forward (dense gso path)."""
    K = weight.shape[0]
    feats = [x]
    if K > 1:
        feats.append(gso @ x)
        for k in range(2, K):
            feats.append(2.0 * (gso @ feats[k - 1]) - feats[k - 2])
    feature = jnp.stack(feats, axis=0)                       # (K, N, F_in)
    out = jnp.einsum('bij,bjk->ik', feature, weight)         # (N, F_out)
    return out + bias


if __name__ == "__main__":
    # Small deterministic problem: K=3 Chebyshev orders, 32 nodes,
    # 16 input features, 64 output features.
    K, N, F_IN, F_OUT = 3, 32, 16, 64

    key = jax.random.PRNGKey(0)
    kx, kg, kw, kb = jax.random.split(key, 4)

    x = jax.random.normal(kx, (N, F_IN), dtype=jnp.float32)
    # symmetric dense "graph shift operator", scaled to be well-behaved
    a = jax.random.normal(kg, (N, N), dtype=jnp.float32)
    gso = (a + a.T) / (2.0 * math.sqrt(N))

    # Parameter init matching reset_parameters(): kaiming_uniform_(a=sqrt(5))
    # on (K, F_in, F_out) -> bound = 1/sqrt(fan_in) with fan_in = F_in*F_out.
    fan_in = F_IN * F_OUT
    bound = 1.0 / math.sqrt(fan_in)
    weight = jax.random.uniform(kw, (K, F_IN, F_OUT), dtype=jnp.float32,
                                minval=-bound, maxval=bound)
    bias = jax.random.uniform(kb, (F_OUT,), dtype=jnp.float32,
                              minval=-bound, maxval=bound)

    ref = _reference(x, gso, weight, bias)

    # f32 MXU path (default): must match the reference tightly.
    out = jax.block_until_ready(cheb_graph_conv(x, gso, weight, bias))
    assert out.shape == (N, F_OUT)
    assert jnp.allclose(out, ref, atol=1e-4, rtol=1e-4), "f32 mismatch"

    # bf16 MXU-input path (v6e/v7x throughput optimization): state and
    # accumulator stay f32, so only a loose tolerance is expected.
    out_bf16 = jax.block_until_ready(
        cheb_graph_conv(x, gso, weight, bias, mxu_dtype=jnp.bfloat16))
    assert out_bf16.shape == (N, F_OUT)
    assert jnp.allclose(out_bf16, ref, atol=1e-1, rtol=1e-1), "bf16 mismatch"

    print("KERNEL_OK")
</pallas_src>

<mosaic_0001>
module attributes {stable_mosaic.version = 11 : i64} {
  func.func @kernel(%arg0: i32, %arg1: memref<32x32xf32, #tpu.memory_space<vmem>>, %arg2: memref<32x16xf32, #tpu.memory_space<vmem>>, %arg3: memref<1x16x128xf32, #tpu.memory_space<vmem>>, %arg4: memref<1x128xf32, #tpu.memory_space<vmem>>, %arg5: memref<32x128xf32, #tpu.memory_space<vmem>>, %arg6: memref<2x32x16xf32, #tpu.memory_space<vmem>>) attributes {dimension_semantics = [#tpu.dimension_semantics<arbitrary>], iteration_bounds = array<i64: 3>, scalar_prefetch = 0 : i64, scratch_operands = 1 : i64, tpu.core_type = #tpu.core_type<tc>, window_params = [{pipeline_mode = #tpu.pipeline_mode<synchronous>, transform_indices = @transform_0, window_bounds = array<i64: 32, 32>}, {pipeline_mode = #tpu.pipeline_mode<synchronous>, transform_indices = @transform_1, window_bounds = array<i64: 32, 16>}, {transform_indices = @transform_2, window_bounds = array<i64: 1, 16, 128>}, {pipeline_mode = #tpu.pipeline_mode<synchronous>, transform_indices = @transform_3, window_bounds = array<i64: 1, 128>}, {pipeline_mode = #tpu.pipeline_mode<synchronous>, transform_indices = @transform_4, window_bounds = array<i64: 32, 128>}]} {
    %c1_i32 = arith.constant 1 : i32
    %0 = arith.andi %arg0, %c1_i32 : i32
    %c1_i32_0 = arith.constant 1 : i32
    %1 = arith.subi %c1_i32_0, %0 : i32
    %c0_i32 = arith.constant 0 : i32
    %2 = arith.cmpi eq, %arg0, %c0_i32 : i32
    %3 = arith.extui %2 : i1 to i32
    %c0_i32_1 = arith.constant 0 : i32
    %4 = arith.cmpi ne, %3, %c0_i32_1 : i32
    scf.if %4 {
      %c0_15 = arith.constant 0 : index
      %c0_16 = arith.constant 0 : index
      %23 = vector.load %arg2[%c0_15, %c0_16] : memref<32x16xf32, #tpu.memory_space<vmem>>, vector<32x16xf32>
      %c0_17 = arith.constant 0 : index
      %c0_18 = arith.constant 0 : index
      %c0_19 = arith.constant 0 : index
      %24 = vector.load %arg6[%c0_17, %c0_18, %c0_19] : memref<2x32x16xf32, #tpu.memory_space<vmem>>, vector<1x32x16xf32>
      %25 = vector.shape_cast %24 : vector<1x32x16xf32> to vector<32x16xf32>
      %26 = vector.shape_cast %23 : vector<32x16xf32> to vector<1x32x16xf32>
      tpu.vector_store %arg6[%c0_17, %c0_18, %c0_19], %26 {strides = array<i32>} : memref<2x32x16xf32, #tpu.memory_space<vmem>>, vector<1x32x16xf32>,
      %cst_20 = arith.constant 0.000000e+00 : f32
      %27 = vector.broadcast %cst_20 : f32 to vector<32x128xf32>
      %c0_21 = arith.constant 0 : index
      %c0_22 = arith.constant 0 : index
      %28 = vector.load %arg5[%c0_21, %c0_22] : memref<32x128xf32, #tpu.memory_space<vmem>>, vector<32x128xf32>
      tpu.vector_store %arg5[%c0_21, %c0_22], %27 {strides = array<i32>} : memref<32x128xf32, #tpu.memory_space<vmem>>, vector<32x128xf32>,
    } else {
    }
    %c1_i32_2 = arith.constant 1 : i32
    %5 = arith.cmpi eq, %arg0, %c1_i32_2 : i32
    %6 = arith.extui %5 : i1 to i32
    %c0_i32_3 = arith.constant 0 : i32
    %7 = arith.cmpi ne, %6, %c0_i32_3 : i32
    scf.if %7 {
      %c0_15 = arith.constant 0 : index
      %c0_16 = arith.constant 0 : index
      %23 = vector.load %arg1[%c0_15, %c0_16] : memref<32x32xf32, #tpu.memory_space<vmem>>, vector<32x32xf32>
      %c0_17 = arith.constant 0 : index
      %c0_18 = arith.constant 0 : index
      %c0_19 = arith.constant 0 : index
      %24 = vector.load %arg6[%c0_17, %c0_18, %c0_19] : memref<2x32x16xf32, #tpu.memory_space<vmem>>, vector<1x32x16xf32>
      %25 = vector.shape_cast %24 : vector<1x32x16xf32> to vector<32x16xf32>
      %cst_20 = arith.constant dense<0.000000e+00> : vector<32x16xf32>
      %26 = tpu.matmul %23, %25, %cst_20 {dimension_numbers = #tpu.dot_dimension_numbers<[1], [0], [0], [1], [0, 0, 1, 1], [], []>} : vector<32x32xf32>, vector<32x16xf32>, vector<32x16xf32> -> vector<32x16xf32>
      %c1 = arith.constant 1 : index
      %c0_21 = arith.constant 0 : index
      %c0_22 = arith.constant 0 : index
      %27 = vector.load %arg6[%c1, %c0_21, %c0_22] : memref<2x32x16xf32, #tpu.memory_space<vmem>>, vector<1x32x16xf32>
      %28 = vector.shape_cast %27 : vector<1x32x16xf32> to vector<32x16xf32>
      %29 = vector.shape_cast %26 : vector<32x16xf32> to vector<1x32x16xf32>
      tpu.vector_store %arg6[%c1, %c0_21, %c0_22], %29 {strides = array<i32>} : memref<2x32x16xf32, #tpu.memory_space<vmem>>, vector<1x32x16xf32>,
    } else {
    }
    %c2_i32 = arith.constant 2 : i32
    %8 = arith.cmpi sge, %arg0, %c2_i32 : i32
    %9 = arith.extui %8 : i1 to i32
    %c0_i32_4 = arith.constant 0 : i32
    %10 = arith.cmpi ne, %9, %c0_i32_4 : i32
    scf.if %10 {
      %c0_15 = arith.constant 0 : index
      %c0_16 = arith.constant 0 : index
      %23 = vector.load %arg1[%c0_15, %c0_16] : memref<32x32xf32, #tpu.memory_space<vmem>>, vector<32x32xf32>
      %24 = arith.index_cast %1 : i32 to index
      %c0_17 = arith.constant 0 : index
      %c0_18 = arith.constant 0 : index
      %25 = vector.load %arg6[%24, %c0_17, %c0_18] : memref<2x32x16xf32, #tpu.memory_space<vmem>>, vector<1x32x16xf32>
      %26 = vector.shape_cast %25 : vector<1x32x16xf32> to vector<32x16xf32>
      %cst_19 = arith.constant dense<0.000000e+00> : vector<32x16xf32>
      %27 = tpu.matmul %23, %26, %cst_19 {dimension_numbers = #tpu.dot_dimension_numbers<[1], [0], [0], [1], [0, 0, 1, 1], [], []>} : vector<32x32xf32>, vector<32x16xf32>, vector<32x16xf32> -> vector<32x16xf32>
      %cst_20 = arith.constant 2.000000e+00 : f32
      %28 = vector.broadcast %cst_20 : f32 to vector<32x16xf32>
      %29 = arith.mulf %28, %27 : vector<32x16xf32>
      %30 = arith.index_cast %0 : i32 to index
      %c0_21 = arith.constant 0 : index
      %c0_22 = arith.constant 0 : index
      %31 = vector.load %arg6[%30, %c0_21, %c0_22] : memref<2x32x16xf32, #tpu.memory_space<vmem>>, vector<1x32x16xf32>
      %32 = vector.shape_cast %31 : vector<1x32x16xf32> to vector<32x16xf32>
      %33 = arith.subf %29, %32 : vector<32x16xf32>
      %34 = arith.index_cast %0 : i32 to index
      %c0_23 = arith.constant 0 : index
      %c0_24 = arith.constant 0 : index
      %35 = vector.load %arg6[%34, %c0_23, %c0_24] : memref<2x32x16xf32, #tpu.memory_space<vmem>>, vector<1x32x16xf32>
      %36 = vector.shape_cast %35 : vector<1x32x16xf32> to vector<32x16xf32>
      %37 = vector.shape_cast %33 : vector<32x16xf32> to vector<1x32x16xf32>
      tpu.vector_store %arg6[%34, %c0_23, %c0_24], %37 {strides = array<i32>} : memref<2x32x16xf32, #tpu.memory_space<vmem>>, vector<1x32x16xf32>,
    } else {
    }
    %c0 = arith.constant 0 : index
    %c0_5 = arith.constant 0 : index
    %11 = vector.load %arg5[%c0, %c0_5] : memref<32x128xf32, #tpu.memory_space<vmem>>, vector<32x128xf32>
    %12 = arith.index_cast %0 : i32 to index
    %c0_6 = arith.constant 0 : index
    %c0_7 = arith.constant 0 : index
    %13 = vector.load %arg6[%12, %c0_6, %c0_7] : memref<2x32x16xf32, #tpu.memory_space<vmem>>, vector<1x32x16xf32>
    %14 = vector.shape_cast %13 : vector<1x32x16xf32> to vector<32x16xf32>
    %c0_8 = arith.constant 0 : index
    %c0_9 = arith.constant 0 : index
    %c0_10 = arith.constant 0 : index
    %15 = vector.load %arg3[%c0_8, %c0_9, %c0_10] : memref<1x16x128xf32, #tpu.memory_space<vmem>>, vector<1x16x128xf32>
    %16 = vector.shape_cast %15 : vector<1x16x128xf32> to vector<16x128xf32>
    %cst = arith.constant dense<0.000000e+00> : vector<32x128xf32>
    %17 = tpu.matmul %14, %16, %cst {dimension_numbers = #tpu.dot_dimension_numbers<[1], [0], [0], [1], [0, 0, 1, 1], [], []>} : vector<32x16xf32>, vector<16x128xf32>, vector<32x128xf32> -> vector<32x128xf32>
    %18 = arith.addf %11, %17 : vector<32x128xf32>
    %c0_11 = arith.constant 0 : index
    %c0_12 = arith.constant 0 : index
    %19 = vector.load %arg5[%c0_11, %c0_12] : memref<32x128xf32, #tpu.memory_space<vmem>>, vector<32x128xf32>
    tpu.vector_store %arg5[%c0_11, %c0_12], %18 {strides = array<i32>} : memref<32x128xf32, #tpu.memory_space<vmem>>, vector<32x128xf32>,
    %c2_i32_13 = arith.constant 2 : i32
    %20 = arith.cmpi eq, %arg0, %c2_i32_13 : i32
    %21 = arith.extui %20 : i1 to i32
    %c0_i32_14 = arith.constant 0 : i32
    %22 = arith.cmpi ne, %21, %c0_i32_14 : i32
    scf.if %22 {
      %c0_15 = arith.constant 0 : index
      %c0_16 = arith.constant 0 : index
      %23 = vector.load %arg5[%c0_15, %c0_16] : memref<32x128xf32, #tpu.memory_space<vmem>>, vector<32x128xf32>
      %c0_17 = arith.constant 0 : index
      %c0_18 = arith.constant 0 : index
      %24 = vector.load %arg4[%c0_17, %c0_18] : memref<1x128xf32, #tpu.memory_space<vmem>>, vector<1x128xf32>
      %25 = vector.broadcast %24 : vector<1x128xf32> to vector<32x128xf32>
      %26 = arith.addf %23, %25 : vector<32x128xf32>
      %c0_19 = arith.constant 0 : index
      %c0_20 = arith.constant 0 : index
      %27 = vector.load %arg5[%c0_19, %c0_20] : memref<32x128xf32, #tpu.memory_space<vmem>>, vector<32x128xf32>
      tpu.vector_store %arg5[%c0_19, %c0_20], %26 {strides = array<i32>} : memref<32x128xf32, #tpu.memory_space<vmem>>, vector<32x128xf32>,
    } else {
    }
    return
  }
  func.func @transform_0(%arg0: i32) -> (i32, i32) {
    %c0_i32 = arith.constant 0 : i32
    %c0_i32_0 = arith.constant 0 : i32
    %c0_i32_1 = arith.constant 0 : i32
    return %c0_i32, %c0_i32_0 : i32, i32
  }
  func.func @transform_1(%arg0: i32) -> (i32, i32) {
    %c0_i32 = arith.constant 0 : i32
    %c0_i32_0 = arith.constant 0 : i32
    %c0_i32_1 = arith.constant 0 : i32
    return %c0_i32, %c0_i32_0 : i32, i32
  }
  func.func @transform_2(%arg0: i32) -> (i32, i32, i32) {
    %c0_i32 = arith.constant 0 : i32
    %c0_i32_0 = arith.constant 0 : i32
    %c0_i32_1 = arith.constant 0 : i32
    return %arg0, %c0_i32, %c0_i32_0 : i32, i32, i32
  }
  func.func @transform_3(%arg0: i32) -> (i32, i32) {
    %c0_i32 = arith.constant 0 : i32
    %c0_i32_0 = arith.constant 0 : i32
    %c0_i32_1 = arith.constant 0 : i32
    return %c0_i32, %c0_i32_0 : i32, i32
  }
  func.func @transform_4(%arg0: i32) -> (i32, i32) {
    %c0_i32 = arith.constant 0 : i32
    %c0_i32_0 = arith.constant 0 : i32
    %c0_i32_1 = arith.constant 0 : i32
    return %c0_i32, %c0_i32_0 : i32, i32
  }
}

module attributes {stable_mosaic.version = 11 : i64} {
  func.func @kernel(%arg0: i32, %arg1: memref<32x32xf32, #tpu.memory_space<vmem>>, %arg2: memref<32x16xf32, #tpu.memory_space<vmem>>, %arg3: memref<1x16x128xf32, #tpu.memory_space<vmem>>, %arg4: memref<1x128xf32, #tpu.memory_space<vmem>>, %arg5: memref<32x128xf32, #tpu.memory_space<vmem>>, %arg6: memref<2x32x16xf32, #tpu.memory_space<vmem>>) attributes {dimension_semantics = [#tpu.dimension_semantics<arbitrary>], iteration_bounds = array<i64: 3>, scalar_prefetch = 0 : i64, scratch_operands = 1 : i64, tpu.core_type = #tpu.core_type<tc>, window_params = [{pipeline_mode = #tpu.pipeline_mode<synchronous>, transform_indices = @transform_0, window_bounds = array<i64: 32, 32>}, {pipeline_mode = #tpu.pipeline_mode<synchronous>, transform_indices = @transform_1, window_bounds = array<i64: 32, 16>}, {transform_indices = @transform_2, window_bounds = array<i64: 1, 16, 128>}, {pipeline_mode = #tpu.pipeline_mode<synchronous>, transform_indices = @transform_3, window_bounds = array<i64: 1, 128>}, {pipeline_mode = #tpu.pipeline_mode<synchronous>, transform_indices = @transform_4, window_bounds = array<i64: 32, 128>}]} {
    %c1_i32 = arith.constant 1 : i32
    %0 = arith.andi %arg0, %c1_i32 : i32
    %c1_i32_0 = arith.constant 1 : i32
    %1 = arith.subi %c1_i32_0, %0 : i32
    %c0_i32 = arith.constant 0 : i32
    %2 = arith.cmpi eq, %arg0, %c0_i32 : i32
    %3 = arith.extui %2 : i1 to i32
    %c0_i32_1 = arith.constant 0 : i32
    %4 = arith.cmpi ne, %3, %c0_i32_1 : i32
    scf.if %4 {
      %c0_15 = arith.constant 0 : index
      %c0_16 = arith.constant 0 : index
      %23 = vector.load %arg2[%c0_15, %c0_16] : memref<32x16xf32, #tpu.memory_space<vmem>>, vector<32x16xf32>
      %c0_17 = arith.constant 0 : index
      %c0_18 = arith.constant 0 : index
      %c0_19 = arith.constant 0 : index
      %24 = vector.load %arg6[%c0_17, %c0_18, %c0_19] : memref<2x32x16xf32, #tpu.memory_space<vmem>>, vector<1x32x16xf32>
      %25 = vector.shape_cast %24 : vector<1x32x16xf32> to vector<32x16xf32>
      %26 = vector.shape_cast %23 : vector<32x16xf32> to vector<1x32x16xf32>
      tpu.vector_store %arg6[%c0_17, %c0_18, %c0_19], %26 {strides = array<i32>} : memref<2x32x16xf32, #tpu.memory_space<vmem>>, vector<1x32x16xf32>,
      %cst_20 = arith.constant 0.000000e+00 : f32
      %27 = vector.broadcast %cst_20 : f32 to vector<32x128xf32>
      %c0_21 = arith.constant 0 : index
      %c0_22 = arith.constant 0 : index
      %28 = vector.load %arg5[%c0_21, %c0_22] : memref<32x128xf32, #tpu.memory_space<vmem>>, vector<32x128xf32>
      tpu.vector_store %arg5[%c0_21, %c0_22], %27 {strides = array<i32>} : memref<32x128xf32, #tpu.memory_space<vmem>>, vector<32x128xf32>,
    } else {
    }
    %c1_i32_2 = arith.constant 1 : i32
    %5 = arith.cmpi eq, %arg0, %c1_i32_2 : i32
    %6 = arith.extui %5 : i1 to i32
    %c0_i32_3 = arith.constant 0 : i32
    %7 = arith.cmpi ne, %6, %c0_i32_3 : i32
    scf.if %7 {
      %c0_15 = arith.constant 0 : index
      %c0_16 = arith.constant 0 : index
      %23 = vector.load %arg1[%c0_15, %c0_16] : memref<32x32xf32, #tpu.memory_space<vmem>>, vector<32x32xf32>
      %c0_17 = arith.constant 0 : index
      %c0_18 = arith.constant 0 : index
      %c0_19 = arith.constant 0 : index
      %24 = vector.load %arg6[%c0_17, %c0_18, %c0_19] : memref<2x32x16xf32, #tpu.memory_space<vmem>>, vector<1x32x16xf32>
      %25 = vector.shape_cast %24 : vector<1x32x16xf32> to vector<32x16xf32>
      %cst_20 = arith.constant dense<0.000000e+00> : vector<32x16xf32>
      %26 = tpu.matmul %23, %25, %cst_20 {dimension_numbers = #tpu.dot_dimension_numbers<[1], [0], [0], [1], [0, 0, 1, 1], [], []>} : vector<32x32xf32>, vector<32x16xf32>, vector<32x16xf32> -> vector<32x16xf32>
      %c1 = arith.constant 1 : index
      %c0_21 = arith.constant 0 : index
      %c0_22 = arith.constant 0 : index
      %27 = vector.load %arg6[%c1, %c0_21, %c0_22] : memref<2x32x16xf32, #tpu.memory_space<vmem>>, vector<1x32x16xf32>
      %28 = vector.shape_cast %27 : vector<1x32x16xf32> to vector<32x16xf32>
      %29 = vector.shape_cast %26 : vector<32x16xf32> to vector<1x32x16xf32>
      tpu.vector_store %arg6[%c1, %c0_21, %c0_22], %29 {strides = array<i32>} : memref<2x32x16xf32, #tpu.memory_space<vmem>>, vector<1x32x16xf32>,
    } else {
    }
    %c2_i32 = arith.constant 2 : i32
    %8 = arith.cmpi sge, %arg0, %c2_i32 : i32
    %9 = arith.extui %8 : i1 to i32
    %c0_i32_4 = arith.constant 0 : i32
    %10 = arith.cmpi ne, %9, %c0_i32_4 : i32
    scf.if %10 {
      %c0_15 = arith.constant 0 : index
      %c0_16 = arith.constant 0 : index
      %23 = vector.load %arg1[%c0_15, %c0_16] : memref<32x32xf32, #tpu.memory_space<vmem>>, vector<32x32xf32>
      %24 = arith.index_cast %1 : i32 to index
      %c0_17 = arith.constant 0 : index
      %c0_18 = arith.constant 0 : index
      %25 = vector.load %arg6[%24, %c0_17, %c0_18] : memref<2x32x16xf32, #tpu.memory_space<vmem>>, vector<1x32x16xf32>
      %26 = vector.shape_cast %25 : vector<1x32x16xf32> to vector<32x16xf32>
      %cst_19 = arith.constant dense<0.000000e+00> : vector<32x16xf32>
      %27 = tpu.matmul %23, %26, %cst_19 {dimension_numbers = #tpu.dot_dimension_numbers<[1], [0], [0], [1], [0, 0, 1, 1], [], []>} : vector<32x32xf32>, vector<32x16xf32>, vector<32x16xf32> -> vector<32x16xf32>
      %cst_20 = arith.constant 2.000000e+00 : f32
      %28 = vector.broadcast %cst_20 : f32 to vector<32x16xf32>
      %29 = arith.mulf %28, %27 : vector<32x16xf32>
      %30 = arith.index_cast %0 : i32 to index
      %c0_21 = arith.constant 0 : index
      %c0_22 = arith.constant 0 : index
      %31 = vector.load %arg6[%30, %c0_21, %c0_22] : memref<2x32x16xf32, #tpu.memory_space<vmem>>, vector<1x32x16xf32>
      %32 = vector.shape_cast %31 : vector<1x32x16xf32> to vector<32x16xf32>
      %33 = arith.subf %29, %32 : vector<32x16xf32>
      %34 = arith.index_cast %0 : i32 to index
      %c0_23 = arith.constant 0 : index
      %c0_24 = arith.constant 0 : index
      %35 = vector.load %arg6[%34, %c0_23, %c0_24] : memref<2x32x16xf32, #tpu.memory_space<vmem>>, vector<1x32x16xf32>
      %36 = vector.shape_cast %35 : vector<1x32x16xf32> to vector<32x16xf32>
      %37 = vector.shape_cast %33 : vector<32x16xf32> to vector<1x32x16xf32>
      tpu.vector_store %arg6[%34, %c0_23, %c0_24], %37 {strides = array<i32>} : memref<2x32x16xf32, #tpu.memory_space<vmem>>, vector<1x32x16xf32>,
    } else {
    }
    %c0 = arith.constant 0 : index
    %c0_5 = arith.constant 0 : index
    %11 = vector.load %arg5[%c0, %c0_5] : memref<32x128xf32, #tpu.memory_space<vmem>>, vector<32x128xf32>
    %12 = arith.index_cast %0 : i32 to index
    %c0_6 = arith.constant 0 : index
    %c0_7 = arith.constant 0 : index
    %13 = vector.load %arg6[%12, %c0_6, %c0_7] : memref<2x32x16xf32, #tpu.memory_space<vmem>>, vector<1x32x16xf32>
    %14 = vector.shape_cast %13 : vector<1x32x16xf32> to vector<32x16xf32>
    %c0_8 = arith.constant 0 : index
    %c0_9 = arith.constant 0 : index
    %c0_10 = arith.constant 0 : index
    %15 = vector.load %arg3[%c0_8, %c0_9, %c0_10] : memref<1x16x128xf32, #tpu.memory_space<vmem>>, vector<1x16x128xf32>
    %16 = vector.shape_cast %15 : vector<1x16x128xf32> to vector<16x128xf32>
    %cst = arith.constant dense<0.000000e+00> : vector<32x128xf32>
    %17 = tpu.matmul %14, %16, %cst {dimension_numbers = #tpu.dot_dimension_numbers<[1], [0], [0], [1], [0, 0, 1, 1], [], []>} : vector<32x16xf32>, vector<16x128xf32>, vector<32x128xf32> -> vector<32x128xf32>
    %18 = arith.addf %11, %17 : vector<32x128xf32>
    %c0_11 = arith.constant 0 : index
    %c0_12 = arith.constant 0 : index
    %19 = vector.load %arg5[%c0_11, %c0_12] : memref<32x128xf32, #tpu.memory_space<vmem>>, vector<32x128xf32>
    tpu.vector_store %arg5[%c0_11, %c0_12], %18 {strides = array<i32>} : memref<32x128xf32, #tpu.memory_space<vmem>>, vector<32x128xf32>,
    %c2_i32_13 = arith.constant 2 : i32
    %20 = arith.cmpi eq, %arg0, %c2_i32_13 : i32
    %21 = arith.extui %20 : i1 to i32
    %c0_i32_14 = arith.constant 0 : i32
    %22 = arith.cmpi ne, %21, %c0_i32_14 : i32
    scf.if %22 {
      %c0_15 = arith.constant 0 : index
      %c0_16 = arith.constant 0 : index
      %23 = vector.load %arg5[%c0_15, %c0_16] : memref<32x128xf32, #tpu.memory_space<vmem>>, vector<32x128xf32>
      %c0_17 = arith.constant 0 : index
      %c0_18 = arith.constant 0 : index
      %24 = vector.load %arg4[%c0_17, %c0_18] : memref<1x128xf32, #tpu.memory_space<vmem>>, vector<1x128xf32>
      %25 = vector.broadcast %24 : vector<1x128xf32> to vector<32x128xf32>
      %26 = arith.addf %23, %25 : vector<32x128xf32>
      %c0_19 = arith.constant 0 : index
      %c0_20 = arith.constant 0 : index
      %27 = vector.load %arg5[%c0_19, %c0_20] : memref<32x128xf32, #tpu.memory_space<vmem>>, vector<32x128xf32>
      tpu.vector_store %arg5[%c0_19, %c0_20], %26 {strides = array<i32>} : memref<32x128xf32, #tpu.memory_space<vmem>>, vector<32x128xf32>,
    } else {
    }
    return
  }
  func.func @transform_0(%arg0: i32) -> (i32, i32) {
    %c0_i32 = arith.constant 0 : i32
    %c0_i32_0 = arith.constant 0 : i32
    %c0_i32_1 = arith.constant 0 : i32
    return %c0_i32, %c0_i32_0 : i32, i32
  }
  func.func @transform_1(%arg0: i32) -> (i32, i32) {
    %c0_i32 = arith.constant 0 : i32
    %c0_i32_0 = arith.constant 0 : i32
    %c0_i32_1 = arith.constant 0 : i32
    return %c0_i32, %c0_i32_0 : i32, i32
  }
  func.func @transform_2(%arg0: i32) -> (i32, i32, i32) {
    %c0_i32 = arith.constant 0 : i32
    %c0_i32_0 = arith.constant 0 : i32
    %c0_i32_1 = arith.constant 0 : i32
    return %arg0, %c0_i32, %c0_i32_0 : i32, i32, i32
  }
  func.func @transform_3(%arg0: i32) -> (i32, i32) {
    %c0_i32 = arith.constant 0 : i32
    %c0_i32_0 = arith.constant 0 : i32
    %c0_i32_1 = arith.constant 0 : i32
    return %c0_i32, %c0_i32_0 : i32, i32
  }
  func.func @transform_4(%arg0: i32) -> (i32, i32) {
    %c0_i32 = arith.constant 0 : i32
    %c0_i32_0 = arith.constant 0 : i32
    %c0_i32_1 = arith.constant 0 : i32
    return %c0_i32, %c0_i32_0 : i32, i32
  }
}

</mosaic_0001>

<bundles_post_ra>
// kernel: tpu_custom_call.1
= control target key start
LH: loop header
LB: loop body
LE: loop exit
PB: predicated region body
PF: predicated region fallthrough
CT: control target
= control target key end

     0   :  { %9 = vsyncpa [#allocation4], 0  ;;  %s1048_s0 = inlined_call_operand.hbm [shape: f32[32,32], index: 0, kind: input, shape index: {}]   ;;  %s1049_s1 = inlined_call_operand.vmem [shape: f32[32,16], index: 1, kind: input, shape index: {}]   ;;  %s1050_s2 = inlined_call_operand.vmem [shape: f32[3,16,128], index: 2, kind: input, shape index: {}]   ;;  %s1051_s3 = inlined_call_operand.vmem [shape: f32[1,128], index: 3, kind: input, shape index: {}]   ;;  %s1052_s4 = inlined_call_operand.hbm [shape: f32[32,128], index: 4, kind: output, shape index: {}]  }
   0x1   :  { %10 = vsyncpa [#allocation5], 0  ;;  %s928_s15 = smov 0  }
   0x2 LB: > { %s934_s16 = sadd.s32 4294967295, %s894_s15   ;;  %p673_p0 = scmp.ge.s32.totalorder %s894_s15, 1  ;;  %s894_s15 = sphi %s928_s15, %s16_s15  }
   0x3   : > { %p131_p1 = scmp.lt.s32.totalorder %s894_s15, 4  ;;  %s896_s17 = smov [#allocation3]  }
   0x4   : > { %s143_s18 = sshll.u32 %s896_s17, 4  ;;  %p1053_p4 = scmp.eq.s32.totalorder %s934_s16, 0  ;;  %s144_s18 = int_to_ptr.vmem [resolvable:$true] %s143_s18 }
   0x5   : > { %p939_p3 = pnand %p673_p0, %p131_p1  ;;  %s826_s23 = scalar_lea.hbm %s1048_s0, 512 }
   0x6   : > { %p827_p7 = scmp.ne.s32.totalorder %s1048_s0, %s826_s23  ;;  %p833_p11 = scmp.lt.u32.totalorder %s826_s23, %s1048_s0 }
   0x7   : > { %s1055_s19 = scalar_select %p939_p3, 1, 0 }
   0x8   : > { %p803_p5 = pneg %p939_p3 }
   0xa   : > { %p948_p6 = pnand %p1053_p4, %p803_p5 }
   0xc   : > { %p828_p8 = pneg %p948_p6 }
   0xe   : > { %p829_p9 = pnand %p828_p8, %p827_p7 }
  0x10   : > { %p830_p10 = pneg %p829_p9 }
  0x12   : > { %p835_p12 = pnand %p833_p11, %p830_p10 }
  0x14   : > { %838 = shalt.err (!%p835_p12)
}
  0x15   : > { %s839_s28 = scalar_lea.vmem %s144_s18, 512  ;;  %p847_p5 = scmp.lt.s32.totalorder %s144_s18, %s144_s18 }
  0x16   : > { %p840_p13 = scmp.ne.s32.totalorder %s144_s18, %s839_s28  ;;  %p848_p2 = scmp.lt.s32.totalorder %s839_s28, %s839_s28 }
  0x18   : > { %p842_p0 = pnand %p840_p13, %p828_p8  ;;  %p849_p4 = por %p848_p2, %p847_p5 }
  0x1a   : > { %p843_p1 = pneg %p842_p0 }
  0x1c   : > { %p850_p3 = pnand %p849_p4, %p843_p1 }
  0x1e   : > { %853 = shalt.err (!%p850_p3)
}
  0x1f   : > { %s897_s29 = smov 128   ;;  %s898_s30 = smov 8  }
  0x20   : > { %806 = dma.hbm_to_vmem [thread:$0]  (!%p948_p6), %s1048_s0, 512, %s144_s18, [#allocation4], %s897_s29, %s897_s29, %s898_s30  }
  0x21   : > { %p1057_p7 = scmp.ne.s32.totalorder %s1055_s19, 0 }
  0x22   : > { %p1058_p9 = scmp.eq.s32.totalorder (!%p1057_p7), %s934_s16, 0 }
  0x23   : > { %173 = sbr.rel (%p1057_p7) target bundleno = 774 (0x306), region = 36 }
  0x2a   : > { %885 = dma.done.wait (%p1058_p9), [#allocation4], 512   ;;  %p1059_p8 = pmov %p1058_p9 }
  0x2b   : > { %p194_p2 = scmp.lt.s32.totalorder %s934_s16, 2  ;;  %s976_s7 = sand.u32 1, %s934_s16 }
  0x2c   : > { %887 = vsyncadd (%p1059_p8), [#allocation4], 4294966784  ;;  %s200_s8 = ssub.s32 1, %s976_s7  ;;  %p1060_p3 = scmp.ne.s32.totalorder %s934_s16, 0 }
  0x2d   : > { %s195_s9 = scalar_select %p194_p2, %s934_s16, 2 }
  0x2e   : > { %204 = sbr.rel (%p1060_p3) target bundleno = 53 (0x35), region = 44  ;;  %v205_v0 = vld [vmem:[%s1049_s1] sm:$0xff] (!%p1060_p3)  ;;  %vm209_vm0 = vcmask (!%p1060_p3), 130048   ;;  %v206_v1 = vld [vmem:[%s1049_s1 + $0x8] sm:$0xff] (!%p1060_p3)  ;;  %v207_v2 = vld [vmem:[%s1049_s1 + $0x10] sm:$0xff] (!%p1060_p3)  ;;  %v899_v4 = vmov (!%p1060_p3), 0.0  }
  0x2f   : > { %s704_s10 = sshll.u32 %s195_s9, 4  ;;  %210 = vst.msk [vmem:[#allocation2] sm:$0xff] (!%p1060_p3), %vm209_vm0, %v205_v0  ;;  %211 = vst.msk [vmem:[#allocation2 + $0x8] sm:$0xff] (!%p1060_p3), %vm209_vm0, %v206_v1  ;;  %v208_v3 = vld [vmem:[%s1049_s1 + $0x18] sm:$0xff] (!%p1060_p3) }
  0x30   : > { %s985_s13 = scalar_lea.vmem %s1050_s2, %s704_s10  ;;  %212 = vst.msk [vmem:[#allocation2 + $0x10] sm:$0xff] (!%p1060_p3), %vm209_vm0, %v207_v2  ;;  %214 = vst [vmem:[#allocation6] sm:$0xff] (!%p1060_p3), %v899_v4 }
  0x31   : > { %215 = vst [vmem:[#allocation6 + $0x8] sm:$0xff] (!%p1060_p3), %v899_v4  ;;  %216 = vst [vmem:[#allocation6 + $0x10] sm:$0xff] (!%p1060_p3), %v899_v4 }
  0x32   : > { %217 = vst [vmem:[#allocation6 + $0x18] sm:$0xff] (!%p1060_p3), %v899_v4  ;;  %213 = vst.msk [vmem:[#allocation2 + $0x18] sm:$0xff] (!%p1060_p3), %vm209_vm0, %v208_v3 }
  0x35 PF: > { %p681_p4 = scmp.ne.s32.totalorder %s934_s16, 1 }
  0x36   : > { %v226_v5 = vld [vmem:[#allocation2] sm:$0xff] (!%p681_p4)  ;;  %v227_v6 = vld [vmem:[#allocation2 + $0x8] sm:$0xff] (!%p681_p4)  ;;  %vm230_vm1 = vcmask (!%p681_p4), 261120   ;;  %v224_v11 = vld [vmem:[#allocation3 + $0x10] sm:$0xff] (!%p681_p4)  ;;  %vm329_vm2 = vcmask (!%p681_p4), 130048  }
  0x37   : > { %221 = sbr.rel (%p681_p4) target bundleno = 279 (0x117), region = 48  ;;  %v228_v7 = vld [vmem:[#allocation2 + $0x10] sm:$0xff] (!%p681_p4)  ;;  %v765_v8 = vpack.c.bf16 (!%p681_p4), %v227_v6, %v226_v5  ;;  %v222_v10 = vld [vmem:[#allocation3] sm:$0xff] (!%p681_p4)  ;;  %738 = vmatprep.mubr.msk.f32.mxu1 (!%p681_p4), %vm230_vm1, %v224_v11  ;;  %v223_v13 = vld [vmem:[#allocation3 + $0x8] sm:$0xff] (!%p681_p4) }
  0x38   : > { %735 = vmatprep.mubr.msk.f32.mxu0 (!%p681_p4), %vm230_vm1, %v222_v10  ;;  %v225_v14 = vld [vmem:[#allocation3 + $0x18] sm:$0xff] (!%p681_p4) }
  0x39   : > { %v229_v9 = vld [vmem:[#allocation2 + $0x18] sm:$0xff] (!%p681_p4)  ;;  %766 = vmatprep.subr.bf16.mxu0 (!%p681_p4), %v765_v8  ;;  %785 = vmatprep.subr.bf16.mxu1 (!%p681_p4), %v765_v8 }
  0x3a   : > { %v769_v12 = vpack.c.bf16 (!%p681_p4), %v229_v9, %v228_v7  ;;  %768 = vmatpush3.bf16.msra.mxu0 (!%p681_p4), %v765_v8  ;;  %787 = vmatpush3.bf16.msra.mxu1 (!%p681_p4), %v765_v8 }
  0x3c   : > { %770 = vmatprep.subr.bf16.mxu0 (!%p681_p4), %v769_v12  ;;  %786 = vmatprep.subr.bf16.mxu1 (!%p681_p4), %v769_v12 }
  0x3e   : > { %772 = vmatpush3.bf16.msra.mxu0 %v769_v12  ;;  %788 = vmatpush3.bf16.msra.mxu1 %v769_v12 }
  0x41   : > { %736 = vmatmul.mubr.msk.f32.vlgmr.msra.gmra.mrb[0].mxu0 %vm230_vm1, %v223_v13  ;;  %739 = vmatmul.mubr.msk.f32.vlgmr.msra.gmra.mrb[0].mxu1 %vm230_vm1, %v225_v14 }
 0x114   : > { %v737_v15 = vpop.f32.mrb[0].mxu0  ;;  %v740_v16 = vpop.f32.mrb[0].mxu1 }
 0x115   : > { %331 = vst.msk [vmem:[#allocation2 + $0x28] sm:$0xff] %vm329_vm2, %v737_v15  ;;  %333 = vst.msk [vmem:[#allocation2 + $0x38] sm:$0xff] %vm329_vm2, %v740_v16  ;;  %v309_v17 = vpop.f32.mrb[1].mxu0  ;;  %v319_v18 = vpop.f32.mrb[1].mxu1 }
 0x116   : > { %330 = vst.msk [vmem:[#allocation2 + $0x20] sm:$0xff] %vm329_vm2, %v309_v17  ;;  %332 = vst.msk [vmem:[#allocation2 + $0x30] sm:$0xff] %vm329_vm2, %v319_v18 }
 0x117 PF: > { %337 = sbr.rel (%p194_p2) target bundleno = 514 (0x202), region = 52  ;;  %s687_s24 = sshll.u32 (!%p194_p2), %s200_s8, 5  ;;  %v338_v19 = vld [vmem:[#allocation3] sm:$0xff] (!%p194_p2)  ;;  %vm348_vm3 = vcmask (!%p194_p2), 261120   ;;  %v340_v20 = vld [vmem:[#allocation3 + $0x10] sm:$0xff] (!%p194_p2)  ;;  %v339_v27 = vld [vmem:[#allocation3 + $0x8] sm:$0xff] (!%p194_p2) }
 0x118   : > { %749 = vmatprep.mubr.msk.f32.mxu0 (!%p194_p2), %vm348_vm3, %v338_v19  ;;  %752 = vmatprep.mubr.msk.f32.mxu1 (!%p194_p2), %vm348_vm3, %v340_v20  ;;  %s343_s25 = scalar_lea.vmem (!%p194_p2), [#allocation2], %s687_s24  ;;  %v341_v28 = vld [vmem:[#allocation3 + $0x18] sm:$0xff] (!%p194_p2)  ;;  %s692_s26 = sshll.u32 (!%p194_p2), %s976_s7, 5  ;;  %vm460_vm4 = vcmask (!%p194_p2), 130048  }
 0x119   : > { %s451_s27 = scalar_lea.vmem (!%p194_p2), [#allocation2], %s692_s26 }
 0x11d   : > { %v344_v21 = vld [vmem:[%s343_s25] sm:$0xff] (!%p194_p2)  ;;  %v345_v22 = vld [vmem:[%s343_s25 + $0x8] sm:$0xff] (!%p194_p2)  ;;  %v346_v23 = vld [vmem:[%s343_s25 + $0x10] sm:$0xff] (!%p194_p2) }
 0x11e   : > { %v773_v24 = vpack.c.bf16 %v345_v22, %v344_v21  ;;  %v347_v25 = vld [vmem:[%s343_s25 + $0x18] sm:$0xff]  ;;  %v453_v30 = vld [vmem:[%s451_s27 + $0x8] sm:$0xff]  ;;  %v452_v36 = vld [vmem:[%s451_s27] sm:$0xff] }
 0x11f   : > { %v777_v26 = vpack.c.bf16 %v347_v25, %v346_v23  ;;  %v455_v32 = vld [vmem:[%s451_s27 + $0x18] sm:$0xff]  ;;  %v454_v38 = vld [vmem:[%s451_s27 + $0x10] sm:$0xff] }
 0x120   : > { %774 = vmatprep.subr.bf16.mxu0 %v773_v24  ;;  %789 = vmatprep.subr.bf16.mxu1 %v773_v24 }
 0x121   : > { %776 = vmatpush3.bf16.msra.mxu0 %v773_v24  ;;  %791 = vmatpush3.bf16.msra.mxu1 %v773_v24 }
 0x122   : > { %778 = vmatprep.subr.bf16.mxu0 %v777_v26  ;;  %790 = vmatprep.subr.bf16.mxu1 %v777_v26 }
 0x125   : > { %780 = vmatpush3.bf16.msra.mxu0 %v777_v26  ;;  %792 = vmatpush3.bf16.msra.mxu1 %v777_v26 }
 0x128   : > { %750 = vmatmul.mubr.msk.f32.vlgmr.msra.gmra.mrb[0].mxu0 %vm348_vm3, %v339_v27  ;;  %753 = vmatmul.mubr.msk.f32.vlgmr.msra.gmra.mrb[0].mxu1 %vm348_vm3, %v341_v28 }
 0x1fb   : > { %v751_v29 = vpop.f32.mrb[0].mxu0  ;;  %v754_v31 = vpop.f32.mrb[0].mxu1 }
 0x1fc   : > { %v447_v33 = vmul.f32 2.0, %v751_v29  ;;  %v449_v34 = vmul.f32 2.0, %v754_v31  ;;  %v427_v35 = vpop.f32.mrb[1].mxu0  ;;  %v437_v37 = vpop.f32.mrb[1].mxu1 }
 0x1fd   : > { %v446_v39 = vmul.f32 2.0, %v427_v35  ;;  %v448_v40 = vmul.f32 2.0, %v437_v37 }
 0x1fe   : > { %v457_v41 = vsub.f32 %v447_v33, %v453_v30  ;;  %v459_v42 = vsub.f32 %v449_v34, %v455_v32 }
 0x1ff   : > { %v456_v43 = vsub.f32 %v446_v39, %v452_v36  ;;  %v458_v44 = vsub.f32 %v448_v40, %v454_v38 }
 0x200   : > { %462 = vst.msk [vmem:[%s451_s27 + $0x8] sm:$0xff] %vm460_vm4, %v457_v41  ;;  %464 = vst.msk [vmem:[%s451_s27 + $0x18] sm:$0xff] %vm460_vm4, %v459_v42 }
 0x201   : > { %461 = vst.msk [vmem:[%s451_s27] sm:$0xff] %vm460_vm4, %v456_v43  ;;  %463 = vst.msk [vmem:[%s451_s27 + $0x10] sm:$0xff] %vm460_vm4, %v458_v44 }
 0x202 PF: > { %v475_v45 = vld [vmem:[%s985_s13] sm:$0xff]  ;;  %v476_v46 = vld [vmem:[%s985_s13 + $0x8] sm:$0xff]  ;;  %s693_s28 = sshll.u32 %s976_s7, 5  ;;  %vm477_vm5 = vcmask 130048   ;;  %v468_v53 = vld [vmem:[#allocation6 + $0x18] sm:$0xff]  ;;  %p698_p6 = scmp.ne.s32.totalorder %s934_s16, 2 }
 0x203   : > { %v781_v47 = vpack.c.bf16 %v476_v46, %v475_v45  ;;  %s470_s29 = scalar_lea.vmem [#allocation2], %s693_s28  ;;  %v466_v52 = vld [vmem:[#allocation6 + $0x8] sm:$0xff]  ;;  %v465_v54 = vld [vmem:[#allocation6] sm:$0xff]  ;;  %v467_v55 = vld [vmem:[#allocation6 + $0x10] sm:$0xff] }
 0x204   : > { %v699_v1 = vld [vmem:[%s1051_s3] ss:$0 sm:$0xff] (!%p698_p6) }
 0x205   : > { %782 = vmatprep.subr.bf16.mxu0 %v781_v47  ;;  %793 = vmatprep.subr.bf16.mxu1 %v781_v47 }
 0x206   : > { %784 = vmatpush3.bf16.msra.mxu0 %v781_v47  ;;  %794 = vmatpush3.bf16.msra.mxu1 %v781_v47 }
 0x208   : > { %v471_v48 = vld [vmem:[%s470_s29] sm:$0xff]  ;;  %v473_v49 = vld [vmem:[%s470_s29 + $0x10] sm:$0xff]  ;;  %v472_v50 = vld [vmem:[%s470_s29 + $0x8] sm:$0xff] }
 0x209   : > { %v474_v51 = vld [vmem:[%s470_s29 + $0x18] sm:$0xff]  ;;  %759 = vmatprep.mubr.msk.f32.mxu0 %vm477_vm5, %v471_v48  ;;  %762 = vmatprep.mubr.msk.f32.mxu1 %vm477_vm5, %v473_v49 }
 0x20a   : > { %760 = vmatmul.mubr.msk.f32.vlgmr.msra.gmra.mrb[0].mxu0 %vm477_vm5, %v472_v50  ;;  %763 = vmatmul.mubr.msk.f32.vlgmr.msra.gmra.mrb[0].mxu1 %vm477_vm5, %v474_v51 }
 0x2db   : > { %586 = sbr.rel (%p698_p6) target bundleno = 748 (0x2ec), region = 56 }
 0x2dd   : > { %v761_v56 = vpop.f32.mrb[0].mxu0  ;;  %v764_v57 = vpop.f32.mrb[0].mxu1 }
 0x2de   : > { %v576_v58 = vadd.f32 %v761_v56, %v466_v52  ;;  %v578_v59 = vadd.f32 %v764_v57, %v468_v53  ;;  %v556_v60 = vpop.f32.mrb[1].mxu0  ;;  %v566_v61 = vpop.f32.mrb[1].mxu1 }
 0x2df   : > { %v575_v62 = vadd.f32 %v556_v60, %v465_v54  ;;  %v577_v63 = vadd.f32 %v566_v61, %v467_v55 }
 0x2e0   : > { %580 = vst [vmem:[#allocation6 + $0x8] sm:$0xff] %v576_v58  ;;  %582 = vst [vmem:[#allocation6 + $0x18] sm:$0xff] %v578_v59 }
 0x2e1   : > { %579 = vst [vmem:[#allocation6] sm:$0xff] %v575_v62  ;;  %581 = vst [vmem:[#allocation6 + $0x10] sm:$0xff] %v577_v63 }
 0x2e7   : > { %v588_v2 = vld [vmem:[#allocation6 + $0x8] sm:$0xff]  ;;  %v590_v6 = vld [vmem:[#allocation6 + $0x18] sm:$0xff] }
 0x2e8   : > { %v587_v0 = vld [vmem:[#allocation6] sm:$0xff]  ;;  %v599_v4 = vadd.f32 %v699_v1, %v588_v2  ;;  %v589_v5 = vld [vmem:[#allocation6 + $0x10] sm:$0xff]  ;;  %v601_v8 = vadd.f32 %v699_v1, %v590_v6 }
 0x2e9   : > { %v598_v3 = vadd.f32 %v699_v1, %v587_v0  ;;  %v600_v7 = vadd.f32 %v699_v1, %v589_v5 }
 0x2ea   : > { %603 = vst [vmem:[#allocation6 + $0x8] sm:$0xff] %v599_v4  ;;  %605 = vst [vmem:[#allocation6 + $0x18] sm:$0xff] %v601_v8 }
 0x2eb   : > { %602 = vst [vmem:[#allocation6] sm:$0xff] %v598_v3  ;;  %604 = vst [vmem:[#allocation6 + $0x10] sm:$0xff] %v600_v7 }
 0x2ec PF: > { %p809_p10 = scmp.eq.s32.totalorder %s934_s16, 2  ;;  %s900_s6 = smov [#allocation6]  }
 0x2ed   : > { %s612_s7 = sshll.u32 %s900_s6, 4  ;;  %s613_s7 = int_to_ptr.vmem [resolvable:$true] %s612_s7 }
 0x2ee   : > { %s854_s8 = scalar_lea.vmem %s613_s7, 512  ;;  %p861_p0 = scmp.lt.s32.totalorder %s613_s7, %s613_s7 }
 0x2ef   : > { %p855_p11 = scmp.ne.s32.totalorder %s613_s7, %s854_s8  ;;  %p862_p1 = scmp.lt.s32.totalorder %s854_s8, %s854_s8 }
 0x2f1   : > { %p856_p12 = pnand %p855_p11, %p809_p10  ;;  %p863_p5 = por %p862_p1, %p861_p0 }
 0x2f3   : > { %p857_p13 = pneg %p856_p12 }
 0x2f5   : > { %p864_p7 = pnand %p863_p5, %p857_p13 }
 0x2f7   : > { %867 = shalt.err (!%p864_p7)
}
 0x2f8   : > { %s868_s11 = scalar_lea.hbm %s1052_s4, 512 }
 0x2f9   : > { %p869_p9 = scmp.ne.s32.totalorder %s1052_s4, %s868_s11  ;;  %p874_p3 = scmp.lt.u32.totalorder %s868_s11, %s1052_s4 }
 0x2fb   : > { %p870_p8 = pnand %p869_p9, %p809_p10 }
 0x2fd   : > { %p871_p2 = pneg %p870_p8 }
 0x2ff   : > { %p876_p4 = pnand %p874_p3, %p871_p2 }
 0x301   : > { %879 = shalt.err (!%p876_p4)
}
 0x302   : > { %s901_s18 = smov 128   ;;  %s902_s19 = smov 8  }
 0x303   : > { %800 = dma.vmem_to_hbm [thread:$0]  (%p809_p10), %s613_s7, 512, %s1052_s4, [#allocation5], %s901_s18, %s901_s18, %s902_s19  }
 0x304   : > { %889 = dma.done.wait (%p809_p10), [#allocation5], 512  }
 0x305   : > { %891 = vsyncadd (%p809_p10), [#allocation5], 4294966784 }
 0x306 PF: > { %s16_s15 = sadd.s32 1, %s894_s15  }
 0x307   : > { %p13_p6 = scmp.ge.s32.totalorder %s16_s15, 5  }
 0x309   :  { %15 = sbr.rel (!%p13_p6) target bundleno = 2 (0x2), region = 88 }
 0x310   :  { %628 = vsyncpa [#allocation4], 1 }
 0x311   :  { %630 = vsyncpa [#allocation4 + $0x1], 1 }
 0x312   :  { %631 = vsyncpa [#allocation5], 1 }
 0x313   :  { %633 = vsyncpa [#allocation5 + $0x1], 1 }

// kernel: tpu_custom_call.1
= control target key start
LH: loop header
LB: loop body
LE: loop exit
PB: predicated region body
PF: predicated region fallthrough
CT: control target
= control target key end

     0   :  { %9 = vsyncpa [#allocation4], 0  ;;  %s1048_s0 = inlined_call_operand.hbm [shape: f32[32,32], index: 0, kind: input, shape index: {}]   ;;  %s1049_s1 = inlined_call_operand.vmem [shape: f32[32,16], index: 1, kind: input, shape index: {}]   ;;  %s1050_s2 = inlined_call_operand.vmem [shape: f32[3,16,128], index: 2, kind: input, shape index: {}]   ;;  %s1051_s3 = inlined_call_operand.vmem [shape: f32[1,128], index: 3, kind: input, shape index: {}]   ;;  %s1052_s4 = inlined_call_operand.hbm [shape: f32[32,128], index: 4, kind: output, shape index: {}]  }
   0x1   :  { %10 = vsyncpa [#allocation5], 0  ;;  %s928_s15 = smov 0  }
   0x2 LB: > { %s934_s16 = sadd.s32 4294967295, %s894_s15   ;;  %p673_p0 = scmp.ge.s32.totalorder %s894_s15, 1  ;;  %s894_s15 = sphi %s928_s15, %s16_s15  }
   0x3   : > { %p131_p1 = scmp.lt.s32.totalorder %s894_s15, 4  ;;  %s896_s17 = smov [#allocation3]  }
   0x4   : > { %s143_s18 = sshll.u32 %s896_s17, 4  ;;  %p1053_p4 = scmp.eq.s32.totalorder %s934_s16, 0  ;;  %s144_s18 = int_to_ptr.vmem [resolvable:$true] %s143_s18 }
   0x5   : > { %p939_p3 = pnand %p673_p0, %p131_p1  ;;  %s826_s23 = scalar_lea.hbm %s1048_s0, 512 }
   0x6   : > { %p827_p7 = scmp.ne.s32.totalorder %s1048_s0, %s826_s23  ;;  %p833_p11 = scmp.lt.u32.totalorder %s826_s23, %s1048_s0 }
   0x7   : > { %s1055_s19 = scalar_select %p939_p3, 1, 0 }
   0x8   : > { %p803_p5 = pneg %p939_p3 }
   0xa   : > { %p948_p6 = pnand %p1053_p4, %p803_p5 }
   0xc   : > { %p828_p8 = pneg %p948_p6 }
   0xe   : > { %p829_p9 = pnand %p828_p8, %p827_p7 }
  0x10   : > { %p830_p10 = pneg %p829_p9 }
  0x12   : > { %p835_p12 = pnand %p833_p11, %p830_p10 }
  0x14   : > { %838 = shalt.err (!%p835_p12)
}
  0x15   : > { %s839_s28 = scalar_lea.vmem %s144_s18, 512  ;;  %p847_p5 = scmp.lt.s32.totalorder %s144_s18, %s144_s18 }
  0x16   : > { %p840_p13 = scmp.ne.s32.totalorder %s144_s18, %s839_s28  ;;  %p848_p2 = scmp.lt.s32.totalorder %s839_s28, %s839_s28 }
  0x18   : > { %p842_p0 = pnand %p840_p13, %p828_p8  ;;  %p849_p4 = por %p848_p2, %p847_p5 }
  0x1a   : > { %p843_p1 = pneg %p842_p0 }
  0x1c   : > { %p850_p3 = pnand %p849_p4, %p843_p1 }
  0x1e   : > { %853 = shalt.err (!%p850_p3)
}
  0x1f   : > { %s897_s29 = smov 128   ;;  %s898_s30 = smov 8  }
  0x20   : > { %806 = dma.hbm_to_vmem [thread:$0]  (!%p948_p6), %s1048_s0, 512, %s144_s18, [#allocation4], %s897_s29, %s897_s29, %s898_s30  }
  0x21   : > { %p1057_p7 = scmp.ne.s32.totalorder %s1055_s19, 0 }
  0x22   : > { %p1058_p9 = scmp.eq.s32.totalorder (!%p1057_p7), %s934_s16, 0 }
  0x23   : > { %173 = sbr.rel (%p1057_p7) target bundleno = 774 (0x306), region = 36 }
  0x2a   : > { %885 = dma.done.wait (%p1058_p9), [#allocation4], 512   ;;  %p1059_p8 = pmov %p1058_p9 }
  0x2b   : > { %p194_p2 = scmp.lt.s32.totalorder %s934_s16, 2  ;;  %s976_s7 = sand.u32 1, %s934_s16 }
  0x2c   : > { %887 = vsyncadd (%p1059_p8), [#allocation4], 4294966784  ;;  %s200_s8 = ssub.s32 1, %s976_s7  ;;  %p1060_p3 = scmp.ne.s32.totalorder %s934_s16, 0 }
  0x2d   : > { %s195_s9 = scalar_select %p194_p2, %s934_s16, 2 }
  0x2e   : > { %204 = sbr.rel (%p1060_p3) target bundleno = 53 (0x35), region = 44  ;;  %v205_v0 = vld [vmem:[%s1049_s1] sm:$0xff] (!%p1060_p3)  ;;  %vm209_vm0 = vcmask (!%p1060_p3), 130048   ;;  %v206_v1 = vld [vmem:[%s1049_s1 + $0x8] sm:$0xff] (!%p1060_p3)  ;;  %v207_v2 = vld [vmem:[%s1049_s1 + $0x10] sm:$0xff] (!%p1060_p3)  ;;  %v899_v4 = vmov (!%p1060_p3), 0.0  }
  0x2f   : > { %s704_s10 = sshll.u32 %s195_s9, 4  ;;  %210 = vst.msk [vmem:[#allocation2] sm:$0xff] (!%p1060_p3), %vm209_vm0, %v205_v0  ;;  %211 = vst.msk [vmem:[#allocation2 + $0x8] sm:$0xff] (!%p1060_p3), %vm209_vm0, %v206_v1  ;;  %v208_v3 = vld [vmem:[%s1049_s1 + $0x18] sm:$0xff] (!%p1060_p3) }
  0x30   : > { %s985_s13 = scalar_lea.vmem %s1050_s2, %s704_s10  ;;  %212 = vst.msk [vmem:[#allocation2 + $0x10] sm:$0xff] (!%p1060_p3), %vm209_vm0, %v207_v2  ;;  %214 = vst [vmem:[#allocation6] sm:$0xff] (!%p1060_p3), %v899_v4 }
  0x31   : > { %215 = vst [vmem:[#allocation6 + $0x8] sm:$0xff] (!%p1060_p3), %v899_v4  ;;  %216 = vst [vmem:[#allocation6 + $0x10] sm:$0xff] (!%p1060_p3), %v899_v4 }
  0x32   : > { %217 = vst [vmem:[#allocation6 + $0x18] sm:$0xff] (!%p1060_p3), %v899_v4  ;;  %213 = vst.msk [vmem:[#allocation2 + $0x18] sm:$0xff] (!%p1060_p3), %vm209_vm0, %v208_v3 }
  0x35 PF: > { %p681_p4 = scmp.ne.s32.totalorder %s934_s16, 1 }
  0x36   : > { %v226_v5 = vld [vmem:[#allocation2] sm:$0xff] (!%p681_p4)  ;;  %v227_v6 = vld [vmem:[#allocation2 + $0x8] sm:$0xff] (!%p681_p4)  ;;  %vm230_vm1 = vcmask (!%p681_p4), 261120   ;;  %v224_v11 = vld [vmem:[#allocation3 + $0x10] sm:$0xff] (!%p681_p4)  ;;  %vm329_vm2 = vcmask (!%p681_p4), 130048  }
  0x37   : > { %221 = sbr.rel (%p681_p4) target bundleno = 279 (0x117), region = 48  ;;  %v228_v7 = vld [vmem:[#allocation2 + $0x10] sm:$0xff] (!%p681_p4)  ;;  %v765_v8 = vpack.c.bf16 (!%p681_p4), %v227_v6, %v226_v5  ;;  %v222_v10 = vld [vmem:[#allocation3] sm:$0xff] (!%p681_p4)  ;;  %738 = vmatprep.mubr.msk.f32.mxu1 (!%p681_p4), %vm230_vm1, %v224_v11  ;;  %v223_v13 = vld [vmem:[#allocation3 + $0x8] sm:$0xff] (!%p681_p4) }
  0x38   : > { %735 = vmatprep.mubr.msk.f32.mxu0 (!%p681_p4), %vm230_vm1, %v222_v10  ;;  %v225_v14 = vld [vmem:[#allocation3 + $0x18] sm:$0xff] (!%p681_p4) }
  0x39   : > { %v229_v9 = vld [vmem:[#allocation2 + $0x18] sm:$0xff] (!%p681_p4)  ;;  %766 = vmatprep.subr.bf16.mxu0 (!%p681_p4), %v765_v8  ;;  %785 = vmatprep.subr.bf16.mxu1 (!%p681_p4), %v765_v8 }
  0x3a   : > { %v769_v12 = vpack.c.bf16 (!%p681_p4), %v229_v9, %v228_v7  ;;  %768 = vmatpush3.bf16.msra.mxu0 (!%p681_p4), %v765_v8  ;;  %787 = vmatpush3.bf16.msra.mxu1 (!%p681_p4), %v765_v8 }
  0x3c   : > { %770 = vmatprep.subr.bf16.mxu0 (!%p681_p4), %v769_v12  ;;  %786 = vmatprep.subr.bf16.mxu1 (!%p681_p4), %v769_v12 }
  0x3e   : > { %772 = vmatpush3.bf16.msra.mxu0 %v769_v12  ;;  %788 = vmatpush3.bf16.msra.mxu1 %v769_v12 }
  0x41   : > { %736 = vmatmul.mubr.msk.f32.vlgmr.msra.gmra.mrb[0].mxu0 %vm230_vm1, %v223_v13  ;;  %739 = vmatmul.mubr.msk.f32.vlgmr.msra.gmra.mrb[0].mxu1 %vm230_vm1, %v225_v14 }
 0x114   : > { %v737_v15 = vpop.f32.mrb[0].mxu0  ;;  %v740_v16 = vpop.f32.mrb[0].mxu1 }
 0x115   : > { %331 = vst.msk [vmem:[#allocation2 + $0x28] sm:$0xff] %vm329_vm2, %v737_v15  ;;  %333 = vst.msk [vmem:[#allocation2 + $0x38] sm:$0xff] %vm329_vm2, %v740_v16  ;;  %v309_v17 = vpop.f32.mrb[1].mxu0  ;;  %v319_v18 = vpop.f32.mrb[1].mxu1 }
 0x116   : > { %330 = vst.msk [vmem:[#allocation2 + $0x20] sm:$0xff] %vm329_vm2, %v309_v17  ;;  %332 = vst.msk [vmem:[#allocation2 + $0x30] sm:$0xff] %vm329_vm2, %v319_v18 }
 0x117 PF: > { %337 = sbr.rel (%p194_p2) target bundleno = 514 (0x202), region = 52  ;;  %s687_s24 = sshll.u32 (!%p194_p2), %s200_s8, 5  ;;  %v338_v19 = vld [vmem:[#allocation3] sm:$0xff] (!%p194_p2)  ;;  %vm348_vm3 = vcmask (!%p194_p2), 261120   ;;  %v340_v20 = vld [vmem:[#allocation3 + $0x10] sm:$0xff] (!%p194_p2)  ;;  %v339_v27 = vld [vmem:[#allocation3 + $0x8] sm:$0xff] (!%p194_p2) }
 0x118   : > { %749 = vmatprep.mubr.msk.f32.mxu0 (!%p194_p2), %vm348_vm3, %v338_v19  ;;  %752 = vmatprep.mubr.msk.f32.mxu1 (!%p194_p2), %vm348_vm3, %v340_v20  ;;  %s343_s25 = scalar_lea.vmem (!%p194_p2), [#allocation2], %s687_s24  ;;  %v341_v28 = vld [vmem:[#allocation3 + $0x18] sm:$0xff] (!%p194_p2)  ;;  %s692_s26 = sshll.u32 (!%p194_p2), %s976_s7, 5  ;;  %vm460_vm4 = vcmask (!%p194_p2), 130048  }
 0x119   : > { %s451_s27 = scalar_lea.vmem (!%p194_p2), [#allocation2], %s692_s26 }
 0x11d   : > { %v344_v21 = vld [vmem:[%s343_s25] sm:$0xff] (!%p194_p2)  ;;  %v345_v22 = vld [vmem:[%s343_s25 + $0x8] sm:$0xff] (!%p194_p2)  ;;  %v346_v23 = vld [vmem:[%s343_s25 + $0x10] sm:$0xff] (!%p194_p2) }
 0x11e   : > { %v773_v24 = vpack.c.bf16 %v345_v22, %v344_v21  ;;  %v347_v25 = vld [vmem:[%s343_s25 + $0x18] sm:$0xff]  ;;  %v453_v30 = vld [vmem:[%s451_s27 + $0x8] sm:$0xff]  ;;  %v452_v36 = vld [vmem:[%s451_s27] sm:$0xff] }
 0x11f   : > { %v777_v26 = vpack.c.bf16 %v347_v25, %v346_v23  ;;  %v455_v32 = vld [vmem:[%s451_s27 + $0x18] sm:$0xff]  ;;  %v454_v38 = vld [vmem:[%s451_s27 + $0x10] sm:$0xff] }
 0x120   : > { %774 = vmatprep.subr.bf16.mxu0 %v773_v24  ;;  %789 = vmatprep.subr.bf16.mxu1 %v773_v24 }
 0x121   : > { %776 = vmatpush3.bf16.msra.mxu0 %v773_v24  ;;  %791 = vmatpush3.bf16.msra.mxu1 %v773_v24 }
 0x122   : > { %778 = vmatprep.subr.bf16.mxu0 %v777_v26  ;;  %790 = vmatprep.subr.bf16.mxu1 %v777_v26 }
 0x125   : > { %780 = vmatpush3.bf16.msra.mxu0 %v777_v26  ;;  %792 = vmatpush3.bf16.msra.mxu1 %v777_v26 }
 0x128   : > { %750 = vmatmul.mubr.msk.f32.vlgmr.msra.gmra.mrb[0].mxu0 %vm348_vm3, %v339_v27  ;;  %753 = vmatmul.mubr.msk.f32.vlgmr.msra.gmra.mrb[0].mxu1 %vm348_vm3, %v341_v28 }
 0x1fb   : > { %v751_v29 = vpop.f32.mrb[0].mxu0  ;;  %v754_v31 = vpop.f32.mrb[0].mxu1 }
 0x1fc   : > { %v447_v33 = vmul.f32 2.0, %v751_v29  ;;  %v449_v34 = vmul.f32 2.0, %v754_v31  ;;  %v427_v35 = vpop.f32.mrb[1].mxu0  ;;  %v437_v37 = vpop.f32.mrb[1].mxu1 }
 0x1fd   : > { %v446_v39 = vmul.f32 2.0, %v427_v35  ;;  %v448_v40 = vmul.f32 2.0, %v437_v37 }
 0x1fe   : > { %v457_v41 = vsub.f32 %v447_v33, %v453_v30  ;;  %v459_v42 = vsub.f32 %v449_v34, %v455_v32 }
 0x1ff   : > { %v456_v43 = vsub.f32 %v446_v39, %v452_v36  ;;  %v458_v44 = vsub.f32 %v448_v40, %v454_v38 }
 0x200   : > { %462 = vst.msk [vmem:[%s451_s27 + $0x8] sm:$0xff] %vm460_vm4, %v457_v41  ;;  %464 = vst.msk [vmem:[%s451_s27 + $0x18] sm:$0xff] %vm460_vm4, %v459_v42 }
 0x201   : > { %461 = vst.msk [vmem:[%s451_s27] sm:$0xff] %vm460_vm4, %v456_v43  ;;  %463 = vst.msk [vmem:[%s451_s27 + $0x10] sm:$0xff] %vm460_vm4, %v458_v44 }
 0x202 PF: > { %v475_v45 = vld [vmem:[%s985_s13] sm:$0xff]  ;;  %v476_v46 = vld [vmem:[%s985_s13 + $0x8] sm:$0xff]  ;;  %s693_s28 = sshll.u32 %s976_s7, 5  ;;  %vm477_vm5 = vcmask 130048   ;;  %v468_v53 = vld [vmem:[#allocation6 + $0x18] sm:$0xff]  ;;  %p698_p6 = scmp.ne.s32.totalorder %s934_s16, 2 }
 0x203   : > { %v781_v47 = vpack.c.bf16 %v476_v46, %v475_v45  ;;  %s470_s29 = scalar_lea.vmem [#allocation2], %s693_s28  ;;  %v466_v52 = vld [vmem:[#allocation6 + $0x8] sm:$0xff]  ;;  %v465_v54 = vld [vmem:[#allocation6] sm:$0xff]  ;;  %v467_v55 = vld [vmem:[#allocation6 + $0x10] sm:$0xff] }
 0x204   : > { %v699_v1 = vld [vmem:[%s1051_s3] ss:$0 sm:$0xff] (!%p698_p6) }
 0x205   : > { %782 = vmatprep.subr.bf16.mxu0 %v781_v47  ;;  %793 = vmatprep.subr.bf16.mxu1 %v781_v47 }
 0x206   : > { %784 = vmatpush3.bf16.msra.mxu0 %v781_v47  ;;  %794 = vmatpush3.bf16.msra.mxu1 %v781_v47 }
 0x208   : > { %v471_v48 = vld [vmem:[%s470_s29] sm:$0xff]  ;;  %v473_v49 = vld [vmem:[%s470_s29 + $0x10] sm:$0xff]  ;;  %v472_v50 = vld [vmem:[%s470_s29 + $0x8] sm:$0xff] }
 0x209   : > { %v474_v51 = vld [vmem:[%s470_s29 + $0x18] sm:$0xff]  ;;  %759 = vmatprep.mubr.msk.f32.mxu0 %vm477_vm5, %v471_v48  ;;  %762 = vmatprep.mubr.msk.f32.mxu1 %vm477_vm5, %v473_v49 }
 0x20a   : > { %760 = vmatmul.mubr.msk.f32.vlgmr.msra.gmra.mrb[0].mxu0 %vm477_vm5, %v472_v50  ;;  %763 = vmatmul.mubr.msk.f32.vlgmr.msra.gmra.mrb[0].mxu1 %vm477_vm5, %v474_v51 }
 0x2db   : > { %586 = sbr.rel (%p698_p6) target bundleno = 748 (0x2ec), region = 56 }
 0x2dd   : > { %v761_v56 = vpop.f32.mrb[0].mxu0  ;;  %v764_v57 = vpop.f32.mrb[0].mxu1 }
 0x2de   : > { %v576_v58 = vadd.f32 %v761_v56, %v466_v52  ;;  %v578_v59 = vadd.f32 %v764_v57, %v468_v53  ;;  %v556_v60 = vpop.f32.mrb[1].mxu0  ;;  %v566_v61 = vpop.f32.mrb[1].mxu1 }
 0x2df   : > { %v575_v62 = vadd.f32 %v556_v60, %v465_v54  ;;  %v577_v63 = vadd.f32 %v566_v61, %v467_v55 }
 0x2e0   : > { %580 = vst [vmem:[#allocation6 + $0x8] sm:$0xff] %v576_v58  ;;  %582 = vst [vmem:[#allocation6 + $0x18] sm:$0xff] %v578_v59 }
 0x2e1   : > { %579 = vst [vmem:[#allocation6] sm:$0xff] %v575_v62  ;;  %581 = vst [vmem:[#allocation6 + $0x10] sm:$0xff] %v577_v63 }
 0x2e7   : > { %v588_v2 = vld [vmem:[#allocation6 + $0x8] sm:$0xff]  ;;  %v590_v6 = vld [vmem:[#allocation6 + $0x18] sm:$0xff] }
 0x2e8   : > { %v587_v0 = vld [vmem:[#allocation6] sm:$0xff]  ;;  %v599_v4 = vadd.f32 %v699_v1, %v588_v2  ;;  %v589_v5 = vld [vmem:[#allocation6 + $0x10] sm:$0xff]  ;;  %v601_v8 = vadd.f32 %v699_v1, %v590_v6 }
 0x2e9   : > { %v598_v3 = vadd.f32 %v699_v1, %v587_v0  ;;  %v600_v7 = vadd.f32 %v699_v1, %v589_v5 }
 0x2ea   : > { %603 = vst [vmem:[#allocation6 + $0x8] sm:$0xff] %v599_v4  ;;  %605 = vst [vmem:[#allocation6 + $0x18] sm:$0xff] %v601_v8 }
 0x2eb   : > { %602 = vst [vmem:[#allocation6] sm:$0xff] %v598_v3  ;;  %604 = vst [vmem:[#allocation6 + $0x10] sm:$0xff] %v600_v7 }
 0x2ec PF: > { %p809_p10 = scmp.eq.s32.totalorder %s934_s16, 2  ;;  %s900_s6 = smov [#allocation6]  }
 0x2ed   : > { %s612_s7 = sshll.u32 %s900_s6, 4  ;;  %s613_s7 = int_to_ptr.vmem [resolvable:$true] %s612_s7 }
 0x2ee   : > { %s854_s8 = scalar_lea.vmem %s613_s7, 512  ;;  %p861_p0 = scmp.lt.s32.totalorder %s613_s7, %s613_s7 }
 0x2ef   : > { %p855_p11 = scmp.ne.s32.totalorder %s613_s7, %s854_s8  ;;  %p862_p1 = scmp.lt.s32.totalorder %s854_s8, %s854_s8 }
 0x2f1   : > { %p856_p12 = pnand %p855_p11, %p809_p10  ;;  %p863_p5 = por %p862_p1, %p861_p0 }
 0x2f3   : > { %p857_p13 = pneg %p856_p12 }
 0x2f5   : > { %p864_p7 = pnand %p863_p5, %p857_p13 }
 0x2f7   : > { %867 = shalt.err (!%p864_p7)
}
 0x2f8   : > { %s868_s11 = scalar_lea.hbm %s1052_s4, 512 }
 0x2f9   : > { %p869_p9 = scmp.ne.s32.totalorder %s1052_s4, %s868_s11  ;;  %p874_p3 = scmp.lt.u32.totalorder %s868_s11, %s1052_s4 }
 0x2fb   : > { %p870_p8 = pnand %p869_p9, %p809_p10 }
 0x2fd   : > { %p871_p2 = pneg %p870_p8 }
 0x2ff   : > { %p876_p4 = pnand %p874_p3, %p871_p2 }
 0x301   : > { %879 = shalt.err (!%p876_p4)
}
 0x302   : > { %s901_s18 = smov 128   ;;  %s902_s19 = smov 8  }
 0x303   : > { %800 = dma.vmem_to_hbm [thread:$0]  (%p809_p10), %s613_s7, 512, %s1052_s4, [#allocation5], %s901_s18, %s901_s18, %s902_s19  }
 0x304   : > { %889 = dma.done.wait (%p809_p10), [#allocation5], 512  }
 0x305   : > { %891 = vsyncadd (%p809_p10), [#allocation5], 4294966784 }
 0x306 PF: > { %s16_s15 = sadd.s32 1, %s894_s15  }
 0x307   : > { %p13_p6 = scmp.ge.s32.totalorder %s16_s15, 5  }
 0x309   :  { %15 = sbr.rel (!%p13_p6) target bundleno = 2 (0x2), region = 88 }
 0x310   :  { %628 = vsyncpa [#allocation4], 1 }
 0x311   :  { %630 = vsyncpa [#allocation4 + $0x1], 1 }
 0x312   :  { %631 = vsyncpa [#allocation5], 1 }
 0x313   :  { %633 = vsyncpa [#allocation5 + $0x1], 1 }

</bundles_post_ra>
